<compile_context>
chip_gen: v5e
topology: v5e:2x2
jax: 0.10.0
libtpu: 0.0.40
codegen_flags: <defaults>
</compile_context>

<pallas_src>
import functools

import jax
import jax.numpy as jnp
from jax.experimental import pallas as pl
from jax.experimental.pallas import tpu as pltpu


def _mish_fast(x):
    # Mish(x) = x * tanh(softplus(x)) = x * u / (u + 2), u = e^x * (e^x + 2).
    # One EUP exp + one EUP approx reciprocal instead of exp + log1p + tanh.
    t = jnp.exp(jnp.minimum(x, 20.0))   # clamp: for x > 20 mish(x) == x in f32
    u = t * (t + 2.0)
    return x * u * pl.reciprocal(u + 2.0, approx=True)


def _mish_ref(x):
    return x * jnp.tanh(jax.nn.softplus(x))


def csp_block_kernel(x_ref, w1_ref, b1_ref, w3_ref, b2_ref, mask_ref, o_ref,
                     *, img_w):
    # x_ref   : (1, Cin, P)  f32    P = H*W (lane-dense)
    # w1_ref  : (Chid, Cin)  bf16   BN1 scale folded in
    # b1_ref  : (Chid, 1)    f32
    # w3_ref  : (9*Cout, Chid) bf16 tap-major (tap = dy*3+dx), BN2 scale folded
    # b2_ref  : (Cout, 1)    f32
    # mask_ref: (9, P)       f32    {0,1} edge-validity mask per 3x3 tap
    P = x_ref.shape[2]
    Cout = o_ref.shape[1]

    x = x_ref[0]                                            # (Cin, P) f32

    # --- Conv 1x1 (+ fused BN) + Mish ------------------------------------
    h = jnp.dot(w1_ref[...], x.astype(jnp.bfloat16),
                preferred_element_type=jnp.float32)         # (Chid, P) f32
    h = _mish_fast(h + b1_ref[...])

    # --- Conv 3x3 (stride 1, pad 1) + fused BN + Mish ---------------------
    # Single MXU call for all 9 taps; shifts/edges handled on the output.
    g = jnp.dot(w3_ref[...], h.astype(jnp.bfloat16),
                preferred_element_type=jnp.float32)         # (9*Cout, P) f32
    mask = mask_ref[...]                                    # (9, P) f32

    y = g[4 * Cout:5 * Cout, :]            # center tap: zero shift, all-ones mask
    for idx in range(9):
        if idx == 4:
            continue
        dy, dx = divmod(idx, 3)
        shift = (-((dy - 1) * img_w + (dx - 1))) % P        # static python int
        gi = g[idx * Cout:(idx + 1) * Cout, :]
        if shift:
            gi = pltpu.roll(gi, shift=shift, axis=1)        # XLU lane rotate
        y = y + gi * mask[idx:idx + 1, :]
    y = _mish_fast(y + b2_ref[...])

    # --- Residual add (residual_activation='linear') -----------------------
    o_ref[0] = y + x


def csp_block(x_nchw, params):
    """CSPBlock forward. x_nchw: (N, C, H, W) f32. params from make_params."""
    w1, s1, b1, w3, s2, b2 = params
    x = x_nchw.astype(jnp.float32)
    N, Cin, H, W = x.shape
    Chid = w1.shape[0]
    Cout = w3.shape[3]
    assert Cin == Cout, "CSPBlock residual requires in_channels == out_channels"
    P = H * W
    assert P % 128 == 0, "H*W must be a multiple of 128 for lane-dense layout"

    x_flat = x.reshape(N, Cin, P)

    # Fold BN scales into conv weights (per output channel); cast to bf16.
    w1_eff = (w1 * s1[:, None]).astype(jnp.bfloat16)                # (Chid, Cin)
    # (3,3,Chid,Cout) HWIO -> tap-major (9*Cout, Chid)
    w3_t = jnp.transpose(w3, (0, 1, 3, 2)) * s2[None, None, :, None]
    w3_eff = w3_t.reshape(9 * Cout, Chid).astype(jnp.bfloat16)      # (9*Cout, Chid)
    b1c = b1.reshape(Chid, 1).astype(jnp.float32)
    b2c = b2.reshape(Cout, 1).astype(jnp.float32)

    # Edge-validity masks for the 9 taps, flattened over (H, W).
    ii = jnp.arange(H)[:, None]
    jj = jnp.arange(W)[None, :]
    masks = []
    for dy in range(3):
        for dx in range(3):
            m = ((ii + dy - 1 >= 0) & (ii + dy - 1 < H) &
                 (jj + dx - 1 >= 0) & (jj + dx - 1 < W))
            masks.append(m.reshape(P))
    mask = jnp.stack(masks, axis=0).astype(jnp.float32)             # (9, P)

    kernel = functools.partial(csp_block_kernel, img_w=W)

    # TODO(synk): for large H*W add a second "parallel" grid axis over row
    # tiles with a 1-row halo so the per-step block stays within v7x VMEM.
    out = pl.pallas_call(
        kernel,
        out_shape=jax.ShapeDtypeStruct((N, Cout, P), jnp.float32),
        grid=(N,),
        in_specs=[
            pl.BlockSpec((1, Cin, P), lambda n: (n, 0, 0)),
            pl.BlockSpec((Chid, Cin), lambda n: (0, 0)),
            pl.BlockSpec((Chid, 1), lambda n: (0, 0)),
            pl.BlockSpec((9 * Cout, Chid), lambda n: (0, 0)),
            pl.BlockSpec((Cout, 1), lambda n: (0, 0)),
            pl.BlockSpec((9, P), lambda n: (0, 0)),
        ],
        out_specs=pl.BlockSpec((1, Cout, P), lambda n: (n, 0, 0)),
        compiler_params=pltpu.CompilerParams(dimension_semantics=("parallel",)),
    )(x_flat, w1_eff, b1c, w3_eff, b2c, mask)

    return out.reshape(N, Cout, H, W)


def make_params(key, in_channels, out_channels, hidden_channels=None):
    """Deterministic synthetic parameters matching CSPBlock.__init__ shapes."""
    if hidden_channels is None:
        hidden_channels = out_channels
    eps = 1e-5
    ks = jax.random.split(key, 10)

    # Conv1: 1x1, in -> hidden, no bias (BN). PyTorch OIHW -> (Chid, Cin).
    w1 = 0.1 * jax.random.normal(ks[0], (hidden_channels, in_channels), jnp.float32)
    g1 = 1.0 + 0.05 * jax.random.normal(ks[1], (hidden_channels,), jnp.float32)
    be1 = 0.05 * jax.random.normal(ks[2], (hidden_channels,), jnp.float32)
    m1 = 0.05 * jax.random.normal(ks[3], (hidden_channels,), jnp.float32)
    v1 = jnp.abs(1.0 + 0.05 * jax.random.normal(ks[4], (hidden_channels,), jnp.float32))
    s1 = g1 / jnp.sqrt(v1 + eps)
    b1 = be1 - m1 * s1

    # Conv2: 3x3, hidden -> out, no bias (BN). Stored HWIO (3,3,Chid,Cout).
    w3 = 0.1 * jax.random.normal(ks[5], (3, 3, hidden_channels, out_channels), jnp.float32)
    g2 = 1.0 + 0.05 * jax.random.normal(ks[6], (out_channels,), jnp.float32)
    be2 = 0.05 * jax.random.normal(ks[7], (out_channels,), jnp.float32)
    m2 = 0.05 * jax.random.normal(ks[8], (out_channels,), jnp.float32)
    v2 = jnp.abs(1.0 + 0.05 * jax.random.normal(ks[9], (out_channels,), jnp.float32))
    s2 = g2 / jnp.sqrt(v2 + eps)
    b2 = be2 - m2 * s2

    return (w1, s1, b1, w3, s2, b2)


def csp_block_reference(x_nchw, params):
    """Pure-JAX f32 reference (exact mish, lax.conv) for validation."""
    w1, s1, b1, w3, s2, b2 = params
    x = x_nchw.astype(jnp.float32)
    h = jnp.einsum('dc,nchw->ndhw', w1, x)
    h = h * s1[None, :, None, None] + b1[None, :, None, None]
    h = _mish_ref(h)
    y = jax.lax.conv_general_dilated(
        h, w3, window_strides=(1, 1), padding='SAME',
        dimension_numbers=('NCHW', 'HWIO', 'NCHW'))
    y = y * s2[None, :, None, None] + b2[None, :, None, None]
    y = _mish_ref(y)
    return y + x


if __name__ == "__main__":
    key = jax.random.PRNGKey(0)
    k_x, k_p = jax.random.split(key)

    N, C, H, W = 2, 4, 16, 16          # in_channels == out_channels for residual
    x = jax.random.normal(k_x, (N, C, H, W), jnp.float32)
    params = make_params(k_p, in_channels=C, out_channels=C)

    out = jax.block_until_ready(csp_block(x, params))
    ref = csp_block_reference(x, params)

    assert out.shape == (N, C, H, W)
    # bf16 matmul operands + approx reciprocal in Mish -> loosened tolerance.
    assert jnp.allclose(out, ref, atol=2e-2, rtol=2e-2), float(
        jnp.max(jnp.abs(out - ref)))

    print("KERNEL_OK")
</pallas_src>

<mosaic_0001>
module attributes {stable_mosaic.version = 11 : i64} {
  func.func @csp_block_kernel(%arg0: i32, %arg1: memref<1x4x256xf32, #tpu.memory_space<vmem>>, %arg2: memref<4x4xbf16, #tpu.memory_space<vmem>>, %arg3: memref<4x1xf32, #tpu.memory_space<vmem>>, %arg4: memref<36x4xbf16, #tpu.memory_space<vmem>>, %arg5: memref<4x1xf32, #tpu.memory_space<vmem>>, %arg6: memref<9x256xf32, #tpu.memory_space<vmem>>, %arg7: memref<1x4x256xf32, #tpu.memory_space<vmem>>) attributes {dimension_semantics = [#tpu.dimension_semantics<parallel>], iteration_bounds = array<i64: 2>, scalar_prefetch = 0 : i64, scratch_operands = 0 : i64, tpu.core_type = #tpu.core_type<tc>, window_params = [{transform_indices = @transform_0, window_bounds = array<i64: 1, 4, 256>}, {pipeline_mode = #tpu.pipeline_mode<synchronous>, transform_indices = @transform_1, window_bounds = array<i64: 4, 4>}, {pipeline_mode = #tpu.pipeline_mode<synchronous>, transform_indices = @transform_2, window_bounds = array<i64: 4, 1>}, {pipeline_mode = #tpu.pipeline_mode<synchronous>, transform_indices = @transform_3, window_bounds = array<i64: 36, 4>}, {pipeline_mode = #tpu.pipeline_mode<synchronous>, transform_indices = @transform_4, window_bounds = array<i64: 4, 1>}, {pipeline_mode = #tpu.pipeline_mode<synchronous>, transform_indices = @transform_5, window_bounds = array<i64: 9, 256>}, {transform_indices = @transform_6, window_bounds = array<i64: 1, 4, 256>}]} {
    %c0 = arith.constant 0 : index
    %c0_0 = arith.constant 0 : index
    %c0_1 = arith.constant 0 : index
    %0 = vector.load %arg1[%c0, %c0_0, %c0_1] : memref<1x4x256xf32, #tpu.memory_space<vmem>>, vector<1x4x256xf32>
    %1 = vector.shape_cast %0 : vector<1x4x256xf32> to vector<4x256xf32>
    %c0_2 = arith.constant 0 : index
    %c0_3 = arith.constant 0 : index
    %2 = vector.load %arg2[%c0_2, %c0_3] : memref<4x4xbf16, #tpu.memory_space<vmem>>, vector<4x4xbf16>
    %3 = arith.truncf %1 : vector<4x256xf32> to vector<4x256xbf16>
    %cst = arith.constant dense<0.000000e+00> : vector<4x256xf32>
    %4 = tpu.matmul %2, %3, %cst {dimension_numbers = #tpu.dot_dimension_numbers<[1], [0], [0], [1], [0, 0, 1, 1], [], []>} : vector<4x4xbf16>, vector<4x256xbf16>, vector<4x256xf32> -> vector<4x256xf32>
    %c0_4 = arith.constant 0 : index
    %c0_5 = arith.constant 0 : index
    %5 = vector.load %arg3[%c0_4, %c0_5] : memref<4x1xf32, #tpu.memory_space<vmem>>, vector<4x1xf32>
    %6 = vector.broadcast %5 : vector<4x1xf32> to vector<4x256xf32>
    %7 = arith.addf %4, %6 : vector<4x256xf32>
    %cst_6 = arith.constant 2.000000e+01 : f32
    %8 = vector.broadcast %cst_6 : f32 to vector<4x256xf32>
    %9 = arith.minimumf %7, %8 : vector<4x256xf32>
    %10 = math.exp %9 : vector<4x256xf32>
    %cst_7 = arith.constant 2.000000e+00 : f32
    %11 = vector.broadcast %cst_7 : f32 to vector<4x256xf32>
    %12 = arith.addf %10, %11 : vector<4x256xf32>
    %13 = arith.mulf %10, %12 : vector<4x256xf32>
    %14 = arith.mulf %7, %13 : vector<4x256xf32>
    %cst_8 = arith.constant 2.000000e+00 : f32
    %15 = vector.broadcast %cst_8 : f32 to vector<4x256xf32>
    %16 = arith.addf %13, %15 : vector<4x256xf32>
    %17 = tpu.reciprocal %16 {approx = true} : vector<4x256xf32> -> vector<4x256xf32>
    %18 = arith.mulf %14, %17 : vector<4x256xf32>
    %c0_9 = arith.constant 0 : index
    %c0_10 = arith.constant 0 : index
    %19 = vector.load %arg4[%c0_9, %c0_10] : memref<36x4xbf16, #tpu.memory_space<vmem>>, vector<36x4xbf16>
    %20 = arith.truncf %18 : vector<4x256xf32> to vector<4x256xbf16>
    %cst_11 = arith.constant dense<0.000000e+00> : vector<36x256xf32>
    %21 = tpu.matmul %19, %20, %cst_11 {dimension_numbers = #tpu.dot_dimension_numbers<[1], [0], [0], [1], [0, 0, 1, 1], [], []>} : vector<36x4xbf16>, vector<4x256xbf16>, vector<36x256xf32> -> vector<36x256xf32>
    %c0_12 = arith.constant 0 : index
    %c0_13 = arith.constant 0 : index
    %22 = vector.load %arg6[%c0_12, %c0_13] : memref<9x256xf32, #tpu.memory_space<vmem>>, vector<9x256xf32>
    %23 = vector.extract_strided_slice %21 {offsets = [16, 0], sizes = [4, 256], strides = [1, 1]} : vector<36x256xf32> to vector<4x256xf32>
    %24 = vector.extract_strided_slice %21 {offsets = [0, 0], sizes = [4, 256], strides = [1, 1]} : vector<36x256xf32> to vector<4x256xf32>
    %c17_i32 = arith.constant 17 : i32
    %25 = tpu.dynamic_rotate %24 by %c17_i32 dim 1 : vector<4x256xf32>, i32 -> vector<4x256xf32>
    %26 = vector.extract_strided_slice %22 {offsets = [0, 0], sizes = [1, 256], strides = [1, 1]} : vector<9x256xf32> to vector<1x256xf32>
    %27 = vector.broadcast %26 : vector<1x256xf32> to vector<4x256xf32>
    %28 = arith.mulf %25, %27 : vector<4x256xf32>
    %29 = arith.addf %23, %28 : vector<4x256xf32>
    %30 = vector.extract_strided_slice %21 {offsets = [4, 0], sizes = [4, 256], strides = [1, 1]} : vector<36x256xf32> to vector<4x256xf32>
    %c16_i32 = arith.constant 16 : i32
    %31 = tpu.dynamic_rotate %30 by %c16_i32 dim 1 : vector<4x256xf32>, i32 -> vector<4x256xf32>
    %32 = vector.extract_strided_slice %22 {offsets = [1, 0], sizes = [1, 256], strides = [1, 1]} : vector<9x256xf32> to vector<1x256xf32>
    %33 = vector.broadcast %32 : vector<1x256xf32> to vector<4x256xf32>
    %34 = arith.mulf %31, %33 : vector<4x256xf32>
    %35 = arith.addf %29, %34 : vector<4x256xf32>
    %36 = vector.extract_strided_slice %21 {offsets = [8, 0], sizes = [4, 256], strides = [1, 1]} : vector<36x256xf32> to vector<4x256xf32>
    %c15_i32 = arith.constant 15 : i32
    %37 = tpu.dynamic_rotate %36 by %c15_i32 dim 1 : vector<4x256xf32>, i32 -> vector<4x256xf32>
    %38 = vector.extract_strided_slice %22 {offsets = [2, 0], sizes = [1, 256], strides = [1, 1]} : vector<9x256xf32> to vector<1x256xf32>
    %39 = vector.broadcast %38 : vector<1x256xf32> to vector<4x256xf32>
    %40 = arith.mulf %37, %39 : vector<4x256xf32>
    %41 = arith.addf %35, %40 : vector<4x256xf32>
    %42 = vector.extract_strided_slice %21 {offsets = [12, 0], sizes = [4, 256], strides = [1, 1]} : vector<36x256xf32> to vector<4x256xf32>
    %c1_i32 = arith.constant 1 : i32
    %43 = tpu.dynamic_rotate %42 by %c1_i32 dim 1 : vector<4x256xf32>, i32 -> vector<4x256xf32>
    %44 = vector.extract_strided_slice %22 {offsets = [3, 0], sizes = [1, 256], strides = [1, 1]} : vector<9x256xf32> to vector<1x256xf32>
    %45 = vector.broadcast %44 : vector<1x256xf32> to vector<4x256xf32>
    %46 = arith.mulf %43, %45 : vector<4x256xf32>
    %47 = arith.addf %41, %46 : vector<4x256xf32>
    %48 = vector.extract_strided_slice %21 {offsets = [20, 0], sizes = [4, 256], strides = [1, 1]} : vector<36x256xf32> to vector<4x256xf32>
    %c255_i32 = arith.constant 255 : i32
    %49 = tpu.dynamic_rotate %48 by %c255_i32 dim 1 : vector<4x256xf32>, i32 -> vector<4x256xf32>
    %50 = vector.extract_strided_slice %22 {offsets = [5, 0], sizes = [1, 256], strides = [1, 1]} : vector<9x256xf32> to vector<1x256xf32>
    %51 = vector.broadcast %50 : vector<1x256xf32> to vector<4x256xf32>
    %52 = arith.mulf %49, %51 : vector<4x256xf32>
    %53 = arith.addf %47, %52 : vector<4x256xf32>
    %54 = vector.extract_strided_slice %21 {offsets = [24, 0], sizes = [4, 256], strides = [1, 1]} : vector<36x256xf32> to vector<4x256xf32>
    %c241_i32 = arith.constant 241 : i32
    %55 = tpu.dynamic_rotate %54 by %c241_i32 dim 1 : vector<4x256xf32>, i32 -> vector<4x256xf32>
    %56 = vector.extract_strided_slice %22 {offsets = [6, 0], sizes = [1, 256], strides = [1, 1]} : vector<9x256xf32> to vector<1x256xf32>
    %57 = vector.broadcast %56 : vector<1x256xf32> to vector<4x256xf32>
    %58 = arith.mulf %55, %57 : vector<4x256xf32>
    %59 = arith.addf %53, %58 : vector<4x256xf32>
    %60 = vector.extract_strided_slice %21 {offsets = [28, 0], sizes = [4, 256], strides = [1, 1]} : vector<36x256xf32> to vector<4x256xf32>
    %c240_i32 = arith.constant 240 : i32
    %61 = tpu.dynamic_rotate %60 by %c240_i32 dim 1 : vector<4x256xf32>, i32 -> vector<4x256xf32>
    %62 = vector.extract_strided_slice %22 {offsets = [7, 0], sizes = [1, 256], strides = [1, 1]} : vector<9x256xf32> to vector<1x256xf32>
    %63 = vector.broadcast %62 : vector<1x256xf32> to vector<4x256xf32>
    %64 = arith.mulf %61, %63 : vector<4x256xf32>
    %65 = arith.addf %59, %64 : vector<4x256xf32>
    %66 = vector.extract_strided_slice %21 {offsets = [32, 0], sizes = [4, 256], strides = [1, 1]} : vector<36x256xf32> to vector<4x256xf32>
    %c239_i32 = arith.constant 239 : i32
    %67 = tpu.dynamic_rotate %66 by %c239_i32 dim 1 : vector<4x256xf32>, i32 -> vector<4x256xf32>
    %68 = vector.extract_strided_slice %22 {offsets = [8, 0], sizes = [1, 256], strides = [1, 1]} : vector<9x256xf32> to vector<1x256xf32>
    %69 = vector.broadcast %68 : vector<1x256xf32> to vector<4x256xf32>
    %70 = arith.mulf %67, %69 : vector<4x256xf32>
    %71 = arith.addf %65, %70 : vector<4x256xf32>
    %c0_14 = arith.constant 0 : index
    %c0_15 = arith.constant 0 : index
    %72 = vector.load %arg5[%c0_14, %c0_15] : memref<4x1xf32, #tpu.memory_space<vmem>>, vector<4x1xf32>
    %73 = vector.broadcast %72 : vector<4x1xf32> to vector<4x256xf32>
    %74 = arith.addf %71, %73 : vector<4x256xf32>
    %cst_16 = arith.constant 2.000000e+01 : f32
    %75 = vector.broadcast %cst_16 : f32 to vector<4x256xf32>
    %76 = arith.minimumf %74, %75 : vector<4x256xf32>
    %77 = math.exp %76 : vector<4x256xf32>
    %cst_17 = arith.constant 2.000000e+00 : f32
    %78 = vector.broadcast %cst_17 : f32 to vector<4x256xf32>
    %79 = arith.addf %77, %78 : vector<4x256xf32>
    %80 = arith.mulf %77, %79 : vector<4x256xf32>
    %81 = arith.mulf %74, %80 : vector<4x256xf32>
    %cst_18 = arith.constant 2.000000e+00 : f32
    %82 = vector.broadcast %cst_18 : f32 to vector<4x256xf32>
    %83 = arith.addf %80, %82 : vector<4x256xf32>
    %84 = tpu.reciprocal %83 {approx = true} : vector<4x256xf32> -> vector<4x256xf32>
    %85 = arith.mulf %81, %84 : vector<4x256xf32>
    %86 = arith.addf %85, %1 : vector<4x256xf32>
    %c0_19 = arith.constant 0 : index
    %c0_20 = arith.constant 0 : index
    %c0_21 = arith.constant 0 : index
    %87 = vector.load %arg7[%c0_19, %c0_20, %c0_21] : memref<1x4x256xf32, #tpu.memory_space<vmem>>, vector<1x4x256xf32>
    %88 = vector.shape_cast %87 : vector<1x4x256xf32> to vector<4x256xf32>
    %89 = vector.shape_cast %86 : vector<4x256xf32> to vector<1x4x256xf32>
    tpu.vector_store %arg7[%c0_19, %c0_20, %c0_21], %89 {strides = array<i32>} : memref<1x4x256xf32, #tpu.memory_space<vmem>>, vector<1x4x256xf32>,
    return
  }
  func.func @transform_0(%arg0: i32) -> (i32, i32, i32) {
    %c0_i32 = arith.constant 0 : i32
    %c0_i32_0 = arith.constant 0 : i32
    %c0_i32_1 = arith.constant 0 : i32
    return %arg0, %c0_i32, %c0_i32_0 : i32, i32, i32
  }
  func.func @transform_1(%arg0: i32) -> (i32, i32) {
    %c0_i32 = arith.constant 0 : i32
    %c0_i32_0 = arith.constant 0 : i32
    %c0_i32_1 = arith.constant 0 : i32
    return %c0_i32, %c0_i32_0 : i32, i32
  }
  func.func @transform_2(%arg0: i32) -> (i32, i32) {
    %c0_i32 = arith.constant 0 : i32
    %c0_i32_0 = arith.constant 0 : i32
    %c0_i32_1 = arith.constant 0 : i32
    return %c0_i32, %c0_i32_0 : i32, i32
  }
  func.func @transform_3(%arg0: i32) -> (i32, i32) {
    %c0_i32 = arith.constant 0 : i32
    %c0_i32_0 = arith.constant 0 : i32
    %c0_i32_1 = arith.constant 0 : i32
    return %c0_i32, %c0_i32_0 : i32, i32
  }
  func.func @transform_4(%arg0: i32) -> (i32, i32) {
    %c0_i32 = arith.constant 0 : i32
    %c0_i32_0 = arith.constant 0 : i32
    %c0_i32_1 = arith.constant 0 : i32
    return %c0_i32, %c0_i32_0 : i32, i32
  }
  func.func @transform_5(%arg0: i32) -> (i32, i32) {
    %c0_i32 = arith.constant 0 : i32
    %c0_i32_0 = arith.constant 0 : i32
    %c0_i32_1 = arith.constant 0 : i32
    return %c0_i32, %c0_i32_0 : i32, i32
  }
  func.func @transform_6(%arg0: i32) -> (i32, i32, i32) {
    %c0_i32 = arith.constant 0 : i32
    %c0_i32_0 = arith.constant 0 : i32
    %c0_i32_1 = arith.constant 0 : i32
    return %arg0, %c0_i32, %c0_i32_0 : i32, i32, i32
  }
}

</mosaic_0001>

<bundles_post_ra>
// kernel: tpu_custom_call.1
= control target key start
LH: loop header
LB: loop body
LE: loop exit
PB: predicated region body
PF: predicated region fallthrough
CT: control target
= control target key end

     0   :  { %11 = vsyncpa [#allocation3], 0  ;;  %s1105_s0 = inlined_call_operand.vmem [shape: f32[2,4,256], index: 0, kind: input, shape index: {}]   ;;  %s1106_s1 = inlined_call_operand.vmem [shape: bf16[4,4], index: 1, kind: input, shape index: {}]   ;;  %s1107_s2 = inlined_call_operand.vmem [shape: f32[4,1], index: 2, kind: input, shape index: {}]   ;;  %s1108_s3 = inlined_call_operand.vmem [shape: bf16[36,4], index: 3, kind: input, shape index: {}]   ;;  %s1109_s4 = inlined_call_operand.vmem [shape: f32[4,1], index: 4, kind: input, shape index: {}]   ;;  %s1110_s5 = inlined_call_operand.hbm [shape: f32[9,256], index: 5, kind: input, shape index: {}]   ;;  %s1111_s6 = inlined_call_operand.hbm [shape: f32[2,4,256], index: 6, kind: output, shape index: {}]  }
   0x1   :  { %12 = vsyncpa [#allocation4], 0 }
   0x2   :  { %14 = vsyncpa [#allocation4 + $0x1], 0  ;;  %s944_s21 = smov 0   ;;  %s946_s22 = smov 0  }
   0x3   :  { %s948_s23 = smov 0   ;;  %s950_s24 = smov 0  }
   0x4 LB: > { %s965_s25 = sadd.s32 4294967295, %s895_s24   ;;  %s682_s26 = sadd.s32 4294967294, %s895_s24   ;;  %s895_s24 = sphi %s950_s24, %s1117_s24   ;;  %s891_s23 = sphi %s948_s23, %s1116_s23   ;;  %s887_s22 = sphi %s946_s22, %s1115_s22   ;;  %s883_s21 = sphi %s944_s21, %s1114_s21  }
   0x5   : > { %s969_s27 = sadd.s32 1, %s895_s24   ;;  %s158_s28 = sadd.s32 1, %s891_s23 }
   0x6   : > { %s155_s29 = ssub.s32 %s895_s24, %s969_s27  ;;  %p168_p0 = scmp.ne.s32.totalorder %s891_s23, %s887_s22 }
   0x7   : > { %p156_p1 = scmp.eq.s32.totalorder %s155_s29, 0  ;;  %p169_p2 = scmp.eq.s32.totalorder %s965_s25, 1 }
   0x8   : > { %p174_p3 = scmp.ne.s32.totalorder %s887_s22, %s883_s21  ;;  %p175_p4 = scmp.eq.s32.totalorder %s682_s26, 1 }
   0x9   : > { %s980_s30 = scalar_select %p156_p1, %s891_s23, %s158_s28  }
   0xa   : > { %p982_p5 = por %p169_p2, %p168_p0  ;;  %p986_p6 = por %p175_p4, %p174_p3 }
   0xb   : > { %p683_p7 = scmp.ge.s32.totalorder %s895_s24, 1  ;;  %p182_p8 = scmp.lt.s32.totalorder %s895_s24, 3 }
   0xc   : > { %p732_p9 = scmp.eq.s32.totalorder %s965_s25, 0  ;;  %s205_s11 = sshll.u32 %s1110_s5, 4  ;;  %s206_s11 = int_to_ptr.hbm [resolvable:$true] %s205_s11 }
   0xd   : > { %p183_p10 = pnand %p683_p7, %p182_p8  ;;  %s897_s12 = smov [#allocation2]  }
   0xe   : > { %s207_s13 = sshll.u32 %s897_s12, 4  ;;  %s898_s14 = smov 256   ;;  %s208_s13 = int_to_ptr.vmem [resolvable:$true] %s207_s13 }
   0xf   : > { %p724_p11 = pneg %p183_p10  ;;  %s899_s15 = smov 16  }
  0x10   : > { %231 = sbr.rel (%p183_p10) target bundleno = 527 (0x20f), region = 44 }
  0x11   : > { %p725_p12 = pnand %p732_p9, %p724_p11 }
  0x13   : > { %727 = dma.hbm_to_vmem [thread:$0]  (!%p725_p12), %s206_s11, 512, %s208_s13, [#allocation3], %s898_s14, %s898_s14, %s899_s15  }
  0x15   : > { %874 = dma.done.wait (%p732_p9), [#allocation3], 512  }
  0x16   : > { %876 = vsyncadd (%p732_p9), [#allocation3], 4294966784  ;;  %p262_p13 = scmp.lt.s32.totalorder %s965_s25, 1  ;;  %v900_v0 = vmov 0   ;;  %v278_v2 = vld [vmem:[%s1107_s2] sm:$0xf] }
  0x17   : > { %779 = vset.pattern.permute.xlu0 %v900_v0  ;;  %780 = vset.pattern.permute.xlu2 %v900_v0  ;;  %vm288_vm0 = vcmask 1041408   ;;  %v269_v9 = vld [vmem:[%s1106_s1] sm:$0x3]  ;;  %vm284_vm1 = vcmask 31744   ;;  %v714_v40 = vld [vmem:[%s1108_s3 + $0x8] sm:$0xff]  ;;  %s903_s18 = smov 15  }
  0x18   : > { %s263_s16 = scalar_select %p262_p13, %s965_s25, 1  ;;  %281 = vperm.xlu0 %779, %v278_v2   ;;  %v713_v38 = vld [vmem:[%s1108_s3] sm:$0xff]  ;;  %v343_v41 = vld [vmem:[%s1108_s3 + $0x10] sm:$0x3]  ;;  %vm590_vm10 = vcmask 1043456  }
  0x19   : > { %v355_v42 = vunpack.c.l.b16 %v343_v41  ;;  %s904_s19 = smov 127   ;;  %s906_s26 = smov 113   ;;  %v554_v0 = vld [vmem:[%s1109_s4] sm:$0xf] }
  0x1a   : > { %s712_s17 = sshll.u32 %s263_s16, 3  ;;  %s901_s16 = smov 17  }
  0x1b   : > { %s266_s20 = scalar_lea.vmem %s1105_s0, %s712_s17  ;;  %v358_v43 = vpack.c.b16 %v355_v42, %v355_v42  ;;  %s902_s17 = smov 16  }
  0x1c   : > { %v268_v1 = vld [vmem:[%s266_s20] sm:$0xff]  ;;  %s905_s20 = smov 1   ;;  %s907_s28 = smov 112  }
  0x1d   : > { %271 = vst [vmem:[#allocation1] ss:$2 sm:$0xff] %v268_v1  ;;  %s908_s29 = smov 111   ;;  %s259_s11 = sand.u32 1, %s887_s22  }
  0x1e   : > { %s688_s12 = sshll.u32 %s259_s11, 3  ;;  %s715_s13 = sshll.u32 %s965_s25, 3 }
  0x1f   : > { %s595_s25 = scalar_lea.sflag [#allocation4], %s259_s11  ;;  %s849_s9 = scalar_lea.hbm %s1111_s6, 16 }
  0x24   : > { %v272_v3 = vld.sshfl [vmem:[#allocation1] sm:$0xff pattern:$0x75316420]  ;;  %v273_v4 = vld.sshfl [vmem:[#allocation1 + $0x8] sm:$0xff pattern:$0x75316420] }
  0x25   : > { %v276_v5 = vpack.c.bf16 %v272_v3, %v272_v3  ;;  %v277_v6 = vpack.c.bf16 %v273_v4, %v273_v4  ;;  %580 = vst [vmem:[#allocation1] ss:$2 sm:$0xff] %v268_v1 }
  0x27   : > { %v290_v7 = vsel %vm288_vm0, %v276_v5, 0  ;;  %v293_v8 = vsel %vm288_vm0, %v277_v6, 0  ;;  %v428_v5 = vlaneseq }
  0x28   : > { %302 = vmatpush.bf16.msra.mxu0 %v290_v7  ;;  %315 = vmatpush.bf16.msra.mxu1 %v293_v8 }
  0x29   : > { %v1043_v7 = vand.u32 127, %v428_v5 }
  0x2b   : > { %691 = vmatmul.msk.bf16.vlgmr.msra.gmra.mxu0 %vm284_vm1, %v269_v9  ;;  %692 = vmatmul.msk.bf16.vlgmr.msra.gmra.mxu1 %vm284_vm1, %v269_v9  ;;  %v1045_v9 = vld [vmem:[#allocation2] sm:$0xff]  ;;  %vm430_vm2 = vcmp.lt.s32.totalorder %v1043_v7, 17  ;;  %vm449_vm3 = vcmp.lt.s32.totalorder %v1043_v7, 16  ;;  %vm462_vm4 = vcmp.lt.s32.totalorder %v1043_v7, 15  ;;  %vm481_vm5 = vcmp.lt.s32.totalorder %v1043_v7, 1 }
  0x2c   : > { %vm500_vm6 = vcmp.lt.s32.totalorder %v1043_v7, 127  ;;  %vm513_vm7 = vcmp.lt.s32.totalorder %v1043_v7, 113  ;;  %vm532_vm8 = vcmp.lt.s32.totalorder %v1043_v7, 112  ;;  %vm545_vm9 = vcmp.lt.s32.totalorder %v1043_v7, 111 }
  0x8a   : > { %v282_v10 = vpop.permute.xlu0 %281 }
  0xa8   : > { %v304_v11 = vpop.f32.mrf.mxu0  ;;  %v317_v12 = vpop.f32.mrf.mxu1 }
  0xa9   : > { %v305_v13 = vadd.f32 %v304_v11, %v282_v10  ;;  %v318_v14 = vadd.f32 %v317_v12, %v282_v10  ;;  %v1047_v10 = vld [vmem:[#allocation2 + $0x8] sm:$0xff]  ;;  %v433_v12 = vperm.slane %v1045_v9, 0 }
  0xab   : > { %v321_v15 = vmin.f32 %v305_v13, 20.0  ;;  %v322_v16 = vmin.f32 %v318_v14, 20.0 }
  0xad   : > { %v323_v17 = vmul.f32 1.442695, %v321_v15  ;;  %v325_v18 = vmul.f32 1.442695, %v322_v16 }
  0xaf   : > { %783 = vpow2.f32 %v323_v17  ;;  %v452_v17 = vperm.slane %v1045_v9, 1 }
  0xb0   : > { %785 = vpow2.f32 %v325_v18  ;;  %v306_v19 = vpop.f32.mrf.mxu0  ;;  %v319_v20 = vpop.f32.mrf.mxu1  ;;  %v453_v18 = vperm.slane %v1047_v10, 1 }
  0xb5   : > { %v784_v21 = vpop.eup %783 }
  0xb6   : > { %v786_v22 = vpop.eup %785  ;;  %v327_v23 = vadd.f32 2.0, %v784_v21 }
  0xb7   : > { %v328_v24 = vadd.f32 2.0, %v786_v22 }
  0xb8   : > { %v329_v25 = vmul.f32 %v784_v21, %v327_v23 }
  0xb9   : > { %v330_v26 = vmul.f32 %v786_v22, %v328_v24 }
  0xba   : > { %v333_v27 = vadd.f32 2.0, %v329_v25  ;;  %v331_v29 = vmul.f32 %v329_v25, %v305_v13  ;;  %v434_v13 = vperm.slane %v1047_v10, 0 }
  0xbb   : > { %v334_v28 = vadd.f32 2.0, %v330_v26  ;;  %v332_v31 = vmul.f32 %v330_v26, %v318_v14  ;;  %v465_v26 = vperm.slane %v1045_v9, 2 }
  0xbc   : > { %787 = vrcp.f32 %v333_v27  ;;  %v466_v27 = vperm.slane %v1047_v10, 2 }
  0xbd   : > { %789 = vrcp.f32 %v334_v28 }
  0xc2   : > { %v788_v30 = vpop.eup %787 }
  0xc3   : > { %v790_v32 = vpop.eup %789  ;;  %v337_v33 = vmul.f32 %v788_v30, %v331_v29 }
  0xc4   : > { %v338_v34 = vmul.f32 %v790_v32, %v332_v31  ;;  %v484_v31 = vperm.slane %v1045_v9, 3  ;;  %v485_v32 = vperm.slane %v1047_v10, 3 }
  0xc5   : > { %v344_v35 = vpack.c.bf16 %v337_v33, %v337_v33 }
  0xc6   : > { %v345_v36 = vpack.c.bf16 %v338_v34, %v338_v34 }
  0xc7   : > { %v369_v37 = vsel %vm288_vm0, %v344_v35, 0 }
  0xc8   : > { %381 = vmatpush.bf16.msrb.mxu0 %v369_v37  ;;  %716 = vmatpush.bf16.msra.mxu2 %v369_v37  ;;  %v372_v39 = vsel %vm288_vm0, %v345_v36, 0 }
  0xc9   : > { %404 = vmatpush.bf16.msrb.mxu1 %v372_v39  ;;  %717 = vmatpush.bf16.msra.mxu3 %v372_v39 }
  0xcb   : > { %701 = vmatmul.msk.bf16.vlgmr.msrb.gmra.mxu0 %vm284_vm1, %v713_v38  ;;  %702 = vmatmul.msk.bf16.vlgmr.msra.gmra.mxu2 %vm284_vm1, %v714_v40 }
  0xcc   : > { %704 = vmatmul.msk.bf16.vlgmr.msrb.gmra.mxu1 %vm284_vm1, %v713_v38  ;;  %705 = vmatmul.msk.bf16.vlgmr.msra.gmra.mxu3 %vm284_vm1, %v714_v40 }
  0xdb   : > { %703 = vmatmul.msk.bf16.gmra.mxu2 %vm284_vm1, %v358_v43 }
  0xdc   : > { %706 = vmatmul.msk.bf16.gmra.mxu3 %vm284_vm1, %v358_v43 }
 0x148   : > { %v383_v44 = vpop.f32.mrf.mxu0 }
 0x149   : > { %v406_v45 = vpop.f32.mrf.mxu1  ;;  %424 = vrot.lane.b32.xlu0 %v383_v44, %s901_s16  ;;  %v441_v47 = vrot.slane %v383_v44, 4  ;;  %v503_v44 = vperm.slane %v1045_v9, 5 }
 0x14a   : > { %426 = vrot.lane.b32.xlu1 %v406_v45, %s901_s16  ;;  %v442_v46 = vrot.slane %v406_v45, 4  ;;  %v504_v45 = vperm.slane %v1047_v10, 5  ;;  %s606_s16 = scalar_lea.hbm %s1111_s6, %s715_s13 }
 0x14c   : > { %447 = vrot.lane.b32.xlu2 %v442_v46, %s902_s17 }
 0x14e   : > { %v1034_v48 = vpop.f32.mrf.mxu2 }
 0x14f   : > { %v1036_v49 = vpop.f32.mrf.mxu3  ;;  %v492_v52 = vrot.slane %v1034_v48, 4 }
 0x150   : > { %v385_v51 = vpop.f32.mrf.mxu0  ;;  %v493_v53 = vrot.slane %v1036_v49, 4 }
 0x151   : > { %v408_v50 = vpop.f32.mrf.mxu1  ;;  %v473_v59 = vrot.slane %v385_v51, 4 }
 0x152   : > { %460 = vrot.lane.b32.xlu0 %v408_v50, %s903_s18  ;;  %445 = vrot.lane.b32.xlu1 %v441_v47, %s902_s17  ;;  %v474_v56 = vrot.slane %v408_v50, 4  ;;  %s261_s17 = scalar_lea.vmem [#allocation5], %s688_s12 }
 0x154   : > { %458 = vrot.lane.b32.xlu2 %v385_v51, %s903_s18  ;;  %s608_s18 = sshll.u32 %s261_s17, 4  ;;  %s609_s18 = int_to_ptr.vmem [resolvable:$true] %s608_s18 }
 0x156   : > { %v390_v54 = vpop.f32.mrf.mxu2 }
 0x157   : > { %v413_v55 = vpop.f32.mrf.mxu3  ;;  %v524_v62 = vrot.slane %v390_v54, 4 }
 0x158   : > { %v525_v63 = vrot.slane %v413_v55, 4 }
 0x15a   : > { %496 = vrot.lane.b32.xlu0 %v492_v52, %s904_s19  ;;  %498 = vrot.lane.b32.xlu1 %v493_v53, %s904_s19  ;;  %s610_s19 = sshll.u32 %s606_s16, 4  ;;  %s611_s19 = int_to_ptr.hbm [resolvable:$true] %s610_s19 }
 0x15c   : > { %479 = vrot.lane.b32.xlu2 %v474_v56, %s905_s20 }
 0x15e   : > { %v393_v57 = vpop.f32.mrf.mxu2 }
 0x15f   : > { %v416_v58 = vpop.f32.mrf.mxu3 }
 0x162   : > { %511 = vrot.lane.b32.xlu0 %v413_v55, %s906_s26  ;;  %477 = vrot.lane.b32.xlu1 %v473_v59, %s905_s20  ;;  %v517_v55 = vperm.slane %v1047_v10, 6  ;;  %v535_v59 = vperm.slane %v1045_v9, 7  ;;  %s843_s20 = sshra.s32 %s611_s19, 4  ;;  %s844_s20 = int_to_ptr.hbm [resolvable:$true] %s843_s20 }
 0x163   : > { %p850_p3 = scmp.lt.s32.totalorder %s844_s20, %s1111_s6 }
 0x164   : > { %509 = vrot.lane.b32.xlu2 %v390_v54, %s906_s26  ;;  %v516_v54 = vperm.slane %v1045_v9, 6  ;;  %s845_s26 = scalar_lea.hbm %s844_s20, 8 }
 0x165   : > { %p846_p0 = scmp.ne.s32.totalorder %s844_s20, %s845_s26  ;;  %p851_p4 = scmp.lt.s32.totalorder %s849_s9, %s845_s26 }
 0x166   : > { %v395_v60 = vpop.f32.mrf.mxu2 }
 0x167   : > { %v418_v61 = vpop.f32.mrf.mxu3  ;;  %v536_v60 = vperm.slane %v1047_v10, 7  ;;  %p847_p1 = pnand %p846_p0, %p982_p5  ;;  %p852_p7 = por %p851_p4, %p850_p3 }
 0x169   : > { %p848_p2 = pneg %p847_p1 }
 0x16a   : > { %528 = vrot.lane.b32.xlu1 %v524_v62, %s907_s28  ;;  %541 = vrot.lane.b32.xlu0 %v393_v57, %s908_s29 }
 0x16b   : > { %p853_p8 = pnand %p852_p7, %p848_p2 }
 0x16c   : > { %530 = vrot.lane.b32.xlu2 %v525_v63, %s907_s28 }
 0x172   : > { %543 = vrot.lane.b32.xlu1 %v416_v58, %s908_s29 }
 0x174   : > { %557 = vperm.xlu2 %780, %v554_v0  }
 0x1a6   : > { %v448_v1 = vpop.permute.xlu2 %447 }
 0x1ae   : > { %v459_v4 = vpop.permute.xlu2 %458 }
 0x1b6   : > { %v480_v11 = vpop.permute.xlu2 %479 }
 0x1bb   : > { %v425_v3 = vpop.permute.xlu0 %424 }
 0x1bc   : > { %v427_v2 = vpop.permute.xlu1 %426 }
 0x1bd   : > { %v431_v15 = vsel %vm430_vm2, %v425_v3, %v427_v2  ;;  %v432_v16 = vsel %vm430_vm2, %v427_v2, %v425_v3 }
 0x1be   : > { %v435_v21 = vmul.f32 %v433_v12, %v432_v16  ;;  %v436_v22 = vmul.f32 %v434_v13, %v431_v15  ;;  %v510_v30 = vpop.permute.xlu2 %509  ;;  %v782_v12 = vld [vmem:[#allocation2 + $0x18] ss:$0 sm:$0xff] }
 0x1c0   : > { %v437_v28 = vadd.f32 %v435_v21, %v1034_v48  ;;  %v438_v29 = vadd.f32 %v436_v22, %v1036_v49 }
 0x1c4   : > { %v446_v6 = vpop.permute.xlu1 %445  ;;  %v461_v8 = vpop.permute.xlu0 %460 }
 0x1c5   : > { %v450_v19 = vsel %vm449_vm3, %v446_v6, %v448_v1  ;;  %v451_v20 = vsel %vm449_vm3, %v448_v1, %v446_v6  ;;  %v463_v34 = vsel %vm462_vm4, %v459_v4, %v461_v8  ;;  %v464_v35 = vsel %vm462_vm4, %v461_v8, %v459_v4 }
 0x1c6   : > { %v454_v24 = vmul.f32 %v452_v17, %v451_v20  ;;  %v455_v25 = vmul.f32 %v453_v18, %v450_v19  ;;  %v467_v40 = vmul.f32 %v465_v26, %v464_v35  ;;  %v468_v41 = vmul.f32 %v466_v27, %v463_v34  ;;  %v531_v56 = vpop.permute.xlu2 %530 }
 0x1c8   : > { %v456_v38 = vadd.f32 %v454_v24, %v437_v28  ;;  %v457_v39 = vadd.f32 %v455_v25, %v438_v29 }
 0x1ca   : > { %v469_v47 = vadd.f32 %v467_v40, %v456_v38  ;;  %v470_v48 = vadd.f32 %v468_v41, %v457_v39  ;;  %v582_v40 = vld.sshfl [vmem:[#allocation1 + $0x8] sm:$0xff pattern:$0x75316420] }
 0x1cc   : > { %v499_v14 = vpop.permute.xlu1 %498  ;;  %v497_v23 = vpop.permute.xlu0 %496 }
 0x1cd   : > { %v501_v49 = vsel %vm500_vm6, %v497_v23, %v499_v14  ;;  %v502_v50 = vsel %vm500_vm6, %v499_v14, %v497_v23 }
 0x1ce   : > { %v505_v57 = vmul.f32 %v503_v44, %v501_v49  ;;  %v506_v58 = vmul.f32 %v504_v45, %v502_v50  ;;  %v558_v20 = vpop.permute.xlu2 %557 }
 0x1d4   : > { %v478_v33 = vpop.permute.xlu1 %477  ;;  %v512_v46 = vpop.permute.xlu0 %511 }
 0x1d5   : > { %v482_v36 = vsel %vm481_vm5, %v478_v33, %v480_v11  ;;  %v483_v37 = vsel %vm481_vm5, %v480_v11, %v478_v33  ;;  %v514_v61 = vsel %vm513_vm7, %v510_v30, %v512_v46  ;;  %v515_v62 = vsel %vm513_vm7, %v512_v46, %v510_v30  ;;  %v781_v11 = vld [vmem:[#allocation2 + $0x10] ss:$0 sm:$0xff] }
 0x1d6   : > { %v486_v42 = vmul.f32 %v484_v31, %v483_v37  ;;  %v487_v43 = vmul.f32 %v485_v32, %v482_v36  ;;  %v518_v3 = vmul.f32 %v516_v54, %v514_v61  ;;  %v519_v4 = vmul.f32 %v517_v55, %v515_v62 }
 0x1d8   : > { %v488_v51 = vadd.f32 %v486_v42, %v469_v47  ;;  %v489_v52 = vadd.f32 %v487_v43, %v470_v48  ;;  %v581_v43 = vld.sshfl [vmem:[#allocation1] sm:$0xff pattern:$0x75316420] }
 0x1da   : > { %v507_v1 = vadd.f32 %v505_v57, %v488_v51  ;;  %v508_v2 = vadd.f32 %v506_v58, %v489_v52 }
 0x1dc   : > { %v529_v53 = vpop.permute.xlu1 %528  ;;  %v542_v8 = vpop.permute.xlu0 %541  ;;  %v520_v14 = vadd.f32 %v518_v3, %v507_v1  ;;  %v521_v9 = vadd.f32 %v519_v4, %v508_v2 }
 0x1dd   : > { %v533_v63 = vsel %vm532_vm8, %v529_v53, %v531_v56  ;;  %v534_v0 = vsel %vm532_vm8, %v531_v56, %v529_v53 }
 0x1de   : > { %v537_v5 = vmul.f32 %v535_v59, %v533_v63  ;;  %v538_v6 = vmul.f32 %v536_v60, %v534_v0 }
 0x1e0   : > { %v539_v18 = vadd.f32 %v537_v5, %v520_v14  ;;  %v540_v19 = vadd.f32 %v538_v6, %v521_v9 }
 0x1e4   : > { %v544_v13 = vpop.permute.xlu1 %543 }
 0x1e5   : > { %v546_v15 = vsel %vm545_vm9, %v542_v8, %v544_v13  ;;  %v547_v10 = vsel %vm545_vm9, %v544_v13, %v542_v8 }
 0x1e6   : > { %v550_v16 = vmul.f32 %v781_v11, %v546_v15  ;;  %v551_v17 = vmul.f32 %v782_v12, %v547_v10 }
 0x1e8   : > { %v552_v21 = vadd.f32 %v550_v16, %v539_v18  ;;  %v553_v22 = vadd.f32 %v551_v17, %v540_v19 }
 0x1ea   : > { %v560_v7 = vadd.f32 %v558_v20, %v552_v21  ;;  %v561_v23 = vadd.f32 %v558_v20, %v553_v22 }
 0x1ec   : > { %v562_v24 = vmin.f32 %v560_v7, 20.0  ;;  %v563_v25 = vmin.f32 %v561_v23, 20.0 }
 0x1ee   : > { %v564_v26 = vmul.f32 1.442695, %v562_v24  ;;  %v566_v27 = vmul.f32 1.442695, %v563_v25 }
 0x1f0   : > { %791 = vpow2.f32 %v564_v26 }
 0x1f1   : > { %793 = vpow2.f32 %v566_v27 }
 0x1f6   : > { %v792_v28 = vpop.eup %791 }
 0x1f7   : > { %v794_v29 = vpop.eup %793  ;;  %v568_v30 = vadd.f32 2.0, %v792_v28 }
 0x1f8   : > { %v569_v31 = vadd.f32 2.0, %v794_v29 }
 0x1f9   : > { %v570_v32 = vmul.f32 %v792_v28, %v568_v30 }
 0x1fa   : > { %v571_v33 = vmul.f32 %v794_v29, %v569_v31 }
 0x1fb   : > { %v574_v34 = vadd.f32 2.0, %v570_v32  ;;  %v572_v37 = vmul.f32 %v570_v32, %v560_v7 }
 0x1fc   : > { %v575_v35 = vadd.f32 2.0, %v571_v33  ;;  %v573_v38 = vmul.f32 %v571_v33, %v561_v23 }
 0x1fd   : > { %795 = vrcp.f32 %v574_v34 }
 0x1fe   : > { %797 = vrcp.f32 %v575_v35 }
 0x203   : > { %v796_v36 = vpop.eup %795 }
 0x204   : > { %v798_v39 = vpop.eup %797  ;;  %v578_v41 = vmul.f32 %v796_v36, %v572_v37 }
 0x205   : > { %v579_v42 = vmul.f32 %v798_v39, %v573_v38 }
 0x206   : > { %v585_v45 = vadd.f32 %v581_v43, %v578_v41 }
 0x207   : > { %v586_v44 = vadd.f32 %v582_v40, %v579_v42 }
 0x209   : > { %v589_v46 = vrot.slane %v586_v44, 4 }
 0x20b   : > { %v591_v47 = vsel %vm590_vm10, %v585_v45, %v589_v46 }
 0x20c   : > { %593 = vst [vmem:[%s261_s17] sm:$0xff] %v591_v47 }
 0x20d   : > { %856 = shalt.err (!%p853_p8)
}
 0x20e   : > { %722 = dma.vmem_to_hbm [thread:$0]  (%p982_p5), %s609_s18, 128, %s611_s19, %s595_s25  }
 0x20f PF: > { %p734_p9 = scmp.ge.s32.totalorder %s895_s24, 2  ;;  %s622_s11 = sand.u32 1, %s883_s21  }
 0x210   : > { %s623_s13 = scalar_lea.sflag [#allocation4], %s622_s11 }
 0x211   : > { %p729_p10 = pnand %p734_p9, %p986_p6 }
 0x213   : > { %p730_p11 = pneg %p729_p10 }
 0x215   : > { %878 = dma.done.wait (%p730_p11), %s623_s13, 128  }
 0x216   : > { %880 = vsyncadd (%p730_p11), %s623_s13, 4294967168  ;;  %p17_p12 = scmp.ge.s32.totalorder %s969_s27, 4   ;;  %s1114_s21 = smov %s887_s22 }
 0x217   : > { %s1115_s22 = smov %s891_s23  ;;  %s1116_s23 = smov %s980_s30 }
 0x218   : > { %s1117_s24 = smov %s969_s27  ;;  %19 = sbr.rel (!%p17_p12) target bundleno = 4 (0x4), region = 84 }
 0x21d   :  { %629 = vsyncpa [#allocation3], 1 }
 0x21e   :  { %631 = vsyncpa [#allocation3 + $0x1], 1 }
 0x21f   :  { %632 = vsyncpa [#allocation4], 1 }
 0x220   :  { %634 = vsyncpa [#allocation4 + $0x1], 1 }

</bundles_post_ra>
